<compile_context>
chip_gen: v7x
topology: tpu7x:2x2x1
jax: 0.10.0
libtpu: 0.0.40
codegen_flags: <defaults>
</compile_context>

<pallas_src>
import math
import functools

import jax
import jax.numpy as jnp
import numpy as np
from jax.experimental import pallas as pl
from jax.experimental.pallas import tpu as pltpu

# ---------------------------------------------------------------------------
# static sizes / lane layout (ONE 128-lane slab for weights, noise and output)
# ---------------------------------------------------------------------------
LANES = 128                  # f32 vreg lane width
ND = 6                       # discrete action_space.n
NC = 3                       # continuous action_space.shape[0]

# matmul / output lane map:
#   0..5    discrete logits             -> out: full log_softmax
#   6..8    mu_lin (softsign -> mu)     -> out: continuous action
#   9..11   sigma_lin                   -> out: continuous log_prob
#   12..14  sigma_lin (duplicated cols) -> out: continuous entropy
#   15      value                       -> out: value
#   16      (free)                      -> out: discrete action (f32)
#   17      (free)                      -> out: discrete entropy
#   18      (free)                      -> out: gathered discrete log_prob
CACT_LO = ND                 # 6
SIG_LO = CACT_LO + NC        # 9   (also continuous log_prob lanes)
CENT_LO = SIG_LO + NC        # 12
VALUE_LANE = 15
DACT_LANE = 16
DENT_LANE = 17
DLPG_LANE = 18
# noise slab: gumbel on lanes 0..5, eps ~ N(0,1) on lanes 9..11 (pre-aligned
# with the sigma lanes so sqrt(sigma)*eps needs no shift).
GUMBEL_LO = 0
EPS_LO = SIG_LO

_VMEM_SPEC = pl.BlockSpec(memory_space=pltpu.MemorySpace.VMEM)


# ---------------------------------------------------------------------------
# parameter init (replicates norm_col_init + zero bias), fused at init time
# ---------------------------------------------------------------------------
def norm_col_init(key, shape, std=1.0):
    w = jax.random.normal(key, shape, jnp.float32)
    return w * std / jnp.sqrt(jnp.sum(jnp.square(w), axis=1, keepdims=True))


def init_tat_head_params(key, input_dim):
    """All head parameters fused into ONE bf16 [input_dim, 128] matrix.

    * single 128-lane half (halves weight DMA bytes vs [K, 2*128]; on v5e it
      also halves the number of 128-wide MXU passes),
    * pre-transposed to [in, out] so the kernel issues a single x @ W,
    * sigma columns duplicated on lanes 12..14 so continuous entropy lands on
      its own output lanes with zero cross-lane moves,
    * stored as bfloat16 (MXU-native, f32 accumulate); safe with std=0.01 init,
    * biases are zero-initialised by the torch module and therefore dropped.
    """
    # TODO(synk): add an optional bias operand (and re-check bf16 rounding) if
    # loading trained, non-zero-bias checkpoints.
    assert input_dim % 8 == 0, "pad the feature dim to a multiple of 8 at init"
    kd, km, ks, kv = jax.random.split(key, 4)
    w_d = norm_col_init(kd, (ND, input_dim), 0.01)     # torch layout [out, in]
    w_mu = norm_col_init(km, (NC, input_dim), 0.01)
    w_sig = norm_col_init(ks, (NC, input_dim), 0.01)
    w_val = norm_col_init(kv, (1, input_dim), 0.01)

    w_all = jnp.zeros((input_dim, LANES), jnp.float32)
    w_all = w_all.at[:, 0:ND].set(w_d.T)
    w_all = w_all.at[:, CACT_LO:CACT_LO + NC].set(w_mu.T)
    w_all = w_all.at[:, SIG_LO:SIG_LO + NC].set(w_sig.T)
    w_all = w_all.at[:, CENT_LO:CENT_LO + NC].set(w_sig.T)   # duplicate (free lanes)
    w_all = w_all.at[:, VALUE_LANE:VALUE_LANE + 1].set(w_val.T)
    raw = (w_d, w_mu, w_sig, w_val)
    return w_all.astype(jnp.bfloat16), raw


def pack_noise(gumbel, eps):
    """Merge gumbel (B, ND) and eps (B, NC) into ONE lane-dense (B, 128) slab:
    one input operand / one HBM->VMEM DMA, identical operands in train & test."""
    B = gumbel.shape[0]
    noise = jnp.zeros((B, LANES), jnp.float32)
    noise = noise.at[:, GUMBEL_LO:GUMBEL_LO + ND].set(gumbel)
    noise = noise.at[:, EPS_LO:EPS_LO + NC].set(eps)
    return noise


# ---------------------------------------------------------------------------
# fused kernel
# ---------------------------------------------------------------------------
def _tat_heads_kernel(test, x_ref, w_ref, noise_ref, out_ref):
    # ONE fused MXU pass: [B, K](bf16) @ [K, 128](bf16) -> f32 accumulate.
    y = jnp.dot(x_ref[...].astype(jnp.bfloat16), w_ref[...],
                preferred_element_type=jnp.float32)
    noise = noise_ref[...]                               # gumbel 0..5 | eps 9..11

    lane = jax.lax.broadcasted_iota(jnp.int32, y.shape, 1)
    d_mask = lane < ND
    neg = jnp.float32(-1e30)

    # ------------------ discrete head (lanes 0..5) ------------------
    m = jnp.max(jnp.where(d_mask, y, neg), axis=1, keepdims=True)
    z = y - m
    ez = jnp.exp(jnp.where(d_mask, z, neg))              # exactly 0 off-mask
    s = jnp.sum(ez, axis=1, keepdims=True)
    prob = ez * pl.reciprocal(s, approx=True)            # EUP slot (otherwise idle);
                                                         # ~1e-3 rel err feeds d_ent only
    logp = z - jnp.log(s)                                # exact; valid on lanes 0..5
    d_ent = -jnp.sum(logp * prob, axis=1, keepdims=True)

    if test:
        score = jnp.where(d_mask, logp, neg)             # argmax(prob) == argmax(logp)
    else:
        score = jnp.where(d_mask, logp + noise, neg)     # Gumbel-max == multinomial(1)
    best = jnp.max(score, axis=1, keepdims=True)
    # first-max index via iota/min (argmax emulation with known-good lowering)
    idx = jnp.min(jnp.where(score == best, lane, jnp.int32(LANES)),
                  axis=1, keepdims=True)
    d_logp_g = jnp.sum(jnp.where(lane == idx, logp, 0.0), axis=1, keepdims=True)
    d_act_f = idx.astype(jnp.float32)

    # ------------------ continuous head (lanes 6..14) ------------------
    mu = jnp.clip(y / (1.0 + jnp.abs(y)), -1.0, 1.0)     # softsign (+ torch clamp), 6..8
    # F.softplus (beta=1, threshold=20) + 1e-5; valid on lanes 9..11 and 12..14
    sigma = jnp.where(y > 20.0, y,
                      jnp.log1p(jnp.exp(jnp.minimum(y, 20.0)))) + 1e-5
    two_pi_sigma = (2.0 * math.pi) * sigma
    delta = jnp.sqrt(sigma) * noise                      # sqrt(sigma)*eps on lanes 9..11
    # prob is evaluated on the *unclamped* sample (matches sample_action()):
    # (act_raw - mu)^2 / (2 sigma) == eps^2 / 2, so it only needs eps & sigma,
    # which are both already on lanes 9..11 -> no cross-lane move.
    prob_c = jnp.exp(-0.5 * jnp.square(noise)) * jax.lax.rsqrt(two_pi_sigma)
    c_logp = jnp.log(prob_c + 1e-6)                      # lanes 9..11
    c_ent = 0.5 * (jnp.log(two_pi_sigma) + 1.0)          # lanes 12..14 (dup sigma cols)

    # Relocate sqrt(sigma)*eps from the sigma lanes (9..11) onto the mu lanes
    # (6..8): three masked cross-lane reductions (XLU slot, otherwise idle).
    zero = jnp.zeros_like(y)
    delta_on_mu = zero
    for k in range(NC):
        d_k = jnp.sum(jnp.where(lane == SIG_LO + k, delta, 0.0),
                      axis=1, keepdims=True)             # (B, 1)
        delta_on_mu = jnp.where(lane == CACT_LO + k, d_k, delta_on_mu)
    c_act = jnp.clip(mu + delta_on_mu, -1.0, 1.0)        # lanes 6..8

    # ------------------ pack ONE lane-dense (B, 128) slab ------------------
    # (VALU has plenty of slack here; the select chain is not the bottleneck.)
    c_mask = jnp.logical_and(lane >= CACT_LO, lane < CACT_LO + NC)
    cl_mask = jnp.logical_and(lane >= SIG_LO, lane < SIG_LO + NC)
    ce_mask = jnp.logical_and(lane >= CENT_LO, lane < CENT_LO + NC)
    slab = jnp.where(d_mask, logp, zero)                 # 0..5   full log_softmax
    slab = jnp.where(c_mask, c_act, slab)                # 6..8   continuous action
    slab = jnp.where(cl_mask, c_logp, slab)              # 9..11  continuous log_prob
    slab = jnp.where(ce_mask, c_ent, slab)               # 12..14 continuous entropy
    slab = jnp.where(lane == VALUE_LANE, y, slab)        # 15     value (zero bias)
    slab = jnp.where(lane == DACT_LANE, d_act_f, slab)   # 16     discrete action
    slab = jnp.where(lane == DENT_LANE, d_ent, slab)     # 17     discrete entropy
    slab = jnp.where(lane == DLPG_LANE, d_logp_g, slab)  # 18     gathered log_prob
    out_ref[...] = slab                                  # single unmasked 128-lane vst


# ---------------------------------------------------------------------------
# wrapper
# ---------------------------------------------------------------------------
@functools.partial(jax.jit, static_argnames=("test",))
def tat_heads_forward(x, w_all, noise, test=False):
    """Fused TAT head forward: critic value + actor (discrete & continuous).

    x     : (B, K) post-encoder/LSTM features (f32)
    w_all : (K, 128) fused bf16 head weight (init_tat_head_params)
    noise : (B, 128) packed noise slab (pack_noise); same operand in both modes
    """
    B = x.shape[0]
    slab = pl.pallas_call(
        functools.partial(_tat_heads_kernel, test),
        out_shape=jax.ShapeDtypeStruct((B, LANES), jnp.float32),
        in_specs=[_VMEM_SPEC] * 3,
        out_specs=_VMEM_SPEC,
        # B=8: single ungridded invocation (one TensorCore). Only add a batch
        # grid + dimension_semantics=("parallel",) once batch is big enough for
        # both v7x TCs to get at least one >=8-row tile each.
    )(x, w_all, noise)
    value = slab[:, VALUE_LANE:VALUE_LANE + 1]
    d_action = slab[:, DACT_LANE].astype(jnp.int32)          # (B,) == np.squeeze
    d_entropy = slab[:, DENT_LANE:DENT_LANE + 1]
    d_logp = slab[:, 0:ND] if test else slab[:, DLPG_LANE:DLPG_LANE + 1]
    c_action = slab[:, CACT_LO:CACT_LO + NC]
    c_entropy = slab[:, CENT_LO:CENT_LO + NC]
    c_logp = slab[:, SIG_LO:SIG_LO + NC]
    return value, (d_action, d_entropy, d_logp), (c_action, c_entropy, c_logp)


# ---------------------------------------------------------------------------
# pure-JAX reference (for a lightweight correctness check)
# ---------------------------------------------------------------------------
def _reference_forward(x, raw, eps, gumbel, test):
    w_d, w_mu, w_sig, w_val = raw
    hp = jax.lax.Precision.HIGHEST
    logits = jnp.dot(x, w_d.T, precision=hp)
    logp = jax.nn.log_softmax(logits, axis=1)
    prob = jax.nn.softmax(logits, axis=1)
    d_ent = -jnp.sum(logp * prob, axis=1, keepdims=True)
    if test:
        d_act = jnp.argmax(prob, axis=1)
        d_logp = logp
    else:
        d_act = jnp.argmax(logp + gumbel, axis=1)
        d_logp = jnp.take_along_axis(logp, d_act[:, None], axis=1)
    value = jnp.dot(x, w_val.T, precision=hp)
    mu_lin = jnp.dot(x, w_mu.T, precision=hp)
    mu = jnp.clip(mu_lin / (1.0 + jnp.abs(mu_lin)), -1.0, 1.0)
    sig_lin = jnp.dot(x, w_sig.T, precision=hp)
    sigma = jnp.where(sig_lin > 20.0, sig_lin,
                      jnp.log1p(jnp.exp(jnp.minimum(sig_lin, 20.0)))) + 1e-5
    act_raw = mu + jnp.sqrt(sigma) * eps
    prob_c = jnp.exp(-jnp.square(act_raw - mu) / (2.0 * sigma)) / jnp.sqrt(2.0 * math.pi * sigma)
    c_act = jnp.clip(act_raw, -1.0, 1.0)
    c_ent = 0.5 * (jnp.log(2.0 * math.pi * sigma) + 1.0)
    c_logp = jnp.log(prob_c + 1e-6)
    return value, (d_act, d_ent, d_logp), (c_act, c_ent, c_logp)


# ---------------------------------------------------------------------------
if __name__ == "__main__":
    key = jax.random.PRNGKey(0)
    kx, kp, kg, ke = jax.random.split(key, 4)

    B, INPUT_DIM = 8, 32
    x = jax.random.normal(kx, (B, INPUT_DIM), jnp.float32)
    w_all, raw = init_tat_head_params(kp, INPUT_DIM)

    gumbel = jax.random.gumbel(kg, (B, ND), jnp.float32)
    eps = jax.random.normal(ke, (B, NC), jnp.float32)
    noise = pack_noise(gumbel, eps)          # single noise slab for both modes

    # train mode (multinomial sample via Gumbel-max) and eval mode (argmax)
    v_tr, (da_tr, de_tr, dl_tr), (ca_tr, ce_tr, cl_tr) = tat_heads_forward(
        x, w_all, noise, test=False)
    v_te, (da_te, de_te, dl_te), (ca_te, ce_te, cl_te) = tat_heads_forward(
        x, w_all, noise, test=True)
    jax.block_until_ready((v_tr, da_tr, de_tr, dl_tr, ca_tr, ce_tr, cl_tr,
                           v_te, da_te, de_te, dl_te, ca_te, ce_te, cl_te))

    # --- lightweight reference check (loose tol: bf16 weights, approx recip) ---
    _, (_, rde, _), (rca, rce, rcl) = _reference_forward(x, raw, eps, gumbel, test=False)
    rv, (_, _, rdl_full), _ = _reference_forward(x, raw, eps, gumbel, test=True)
    tol = dict(rtol=1e-2, atol=1e-2)
    np.testing.assert_allclose(np.asarray(v_tr), np.asarray(rv), **tol)
    np.testing.assert_allclose(np.asarray(de_tr), np.asarray(rde), **tol)
    np.testing.assert_allclose(np.asarray(dl_te), np.asarray(rdl_full), **tol)
    np.testing.assert_allclose(np.asarray(ca_tr), np.asarray(rca), **tol)
    np.testing.assert_allclose(np.asarray(ce_tr), np.asarray(rce), **tol)
    np.testing.assert_allclose(np.asarray(cl_tr), np.asarray(rcl), **tol)
    # sampled index is valid, and gathered log_prob matches the reference
    # log_softmax at the kernel's own sampled index
    da_np = np.asarray(da_tr)
    assert da_np.min() >= 0 and da_np.max() < ND
    ref_gather = np.take_along_axis(np.asarray(rdl_full), da_np[:, None], axis=1)
    np.testing.assert_allclose(np.asarray(dl_tr), ref_gather, **tol)
    # eval-mode action is the argmax of the kernel's own log_softmax
    np.testing.assert_array_equal(np.asarray(da_te),
                                  np.argmax(np.asarray(dl_te), axis=1))

    print("KERNEL_OK")
</pallas_src>

<mosaic_0001>
module attributes {stable_mosaic.version = 11 : i64} {
  func.func @_tat_heads_kernel(%arg0: memref<8x32xf32, #tpu.memory_space<vmem>>, %arg1: memref<32x128xbf16, #tpu.memory_space<vmem>>, %arg2: memref<8x128xf32, #tpu.memory_space<vmem>>, %arg3: memref<8x128xf32, #tpu.memory_space<vmem>>) attributes {dimension_semantics = [], scalar_prefetch = 0 : i64, scratch_operands = 0 : i64, tpu.core_type = #tpu.core_type<tc>} {
    %c0 = arith.constant 0 : index
    %c0_0 = arith.constant 0 : index
    %0 = vector.load %arg0[%c0, %c0_0] : memref<8x32xf32, #tpu.memory_space<vmem>>, vector<8x32xf32>
    %1 = arith.truncf %0 : vector<8x32xf32> to vector<8x32xbf16>
    %c0_1 = arith.constant 0 : index
    %c0_2 = arith.constant 0 : index
    %2 = vector.load %arg1[%c0_1, %c0_2] : memref<32x128xbf16, #tpu.memory_space<vmem>>, vector<32x128xbf16>
    %cst = arith.constant dense<0.000000e+00> : vector<8x128xf32>
    %3 = tpu.matmul %1, %2, %cst {dimension_numbers = #tpu.dot_dimension_numbers<[1], [0], [0], [1], [0, 0, 1, 1], [], []>} : vector<8x32xbf16>, vector<32x128xbf16>, vector<8x128xf32> -> vector<8x128xf32>
    %c0_3 = arith.constant 0 : index
    %c0_4 = arith.constant 0 : index
    %4 = vector.load %arg2[%c0_3, %c0_4] : memref<8x128xf32, #tpu.memory_space<vmem>>, vector<8x128xf32>
    %5 = tpu.iota {dimensions = array<i32: 1>} : vector<8x128xi32>
    %c6_i32 = arith.constant 6 : i32
    %6 = vector.broadcast %c6_i32 : i32 to vector<8x128xi32>
    %7 = arith.cmpi slt, %5, %6 : vector<8x128xi32>
    %cst_5 = arith.constant -1.000000e+30 : f32
    %8 = vector.broadcast %cst_5 : f32 to vector<8x128xf32>
    %9 = arith.select %7, %3, %8 : vector<8x128xi1>, vector<8x128xf32>
    %cst_6 = arith.constant dense<0xFF800000> : vector<8xf32>
    %10 = vector.multi_reduction <maximumf>, %9, %cst_6 [1] : vector<8x128xf32> to vector<8xf32>
    %11 = vector.shape_cast %10 : vector<8xf32> to vector<8x1xf32>
    %12 = vector.broadcast %11 : vector<8x1xf32> to vector<8x128xf32>
    %13 = arith.subf %3, %12 : vector<8x128xf32>
    %cst_7 = arith.constant -1.000000e+30 : f32
    %14 = vector.broadcast %cst_7 : f32 to vector<8x128xf32>
    %15 = arith.select %7, %13, %14 : vector<8x128xi1>, vector<8x128xf32>
    %16 = math.exp %15 : vector<8x128xf32>
    %cst_8 = arith.constant dense<0.000000e+00> : vector<8xf32>
    %17 = vector.multi_reduction <add>, %16, %cst_8 [1] : vector<8x128xf32> to vector<8xf32>
    %18 = vector.shape_cast %17 : vector<8xf32> to vector<8x1xf32>
    %19 = tpu.reciprocal %18 {approx = true} : vector<8x1xf32> -> vector<8x1xf32>
    %20 = vector.broadcast %19 : vector<8x1xf32> to vector<8x128xf32>
    %21 = arith.mulf %16, %20 : vector<8x128xf32>
    %22 = math.log %18 : vector<8x1xf32>
    %23 = vector.broadcast %22 : vector<8x1xf32> to vector<8x128xf32>
    %24 = arith.subf %13, %23 : vector<8x128xf32>
    %25 = arith.mulf %24, %21 : vector<8x128xf32>
    %cst_9 = arith.constant dense<0.000000e+00> : vector<8xf32>
    %26 = vector.multi_reduction <add>, %25, %cst_9 [1] : vector<8x128xf32> to vector<8xf32>
    %27 = vector.shape_cast %26 : vector<8xf32> to vector<8x1xf32>
    %cst_10 = arith.constant 0.000000e+00 : f32
    %28 = vector.broadcast %cst_10 : f32 to vector<8x1xf32>
    %29 = arith.subf %28, %27 : vector<8x1xf32>
    %30 = arith.addf %24, %4 : vector<8x128xf32>
    %cst_11 = arith.constant -1.000000e+30 : f32
    %31 = vector.broadcast %cst_11 : f32 to vector<8x128xf32>
    %32 = arith.select %7, %30, %31 : vector<8x128xi1>, vector<8x128xf32>
    %cst_12 = arith.constant dense<0xFF800000> : vector<8xf32>
    %33 = vector.multi_reduction <maximumf>, %32, %cst_12 [1] : vector<8x128xf32> to vector<8xf32>
    %34 = vector.shape_cast %33 : vector<8xf32> to vector<8x1xf32>
    %35 = vector.broadcast %34 : vector<8x1xf32> to vector<8x128xf32>
    %36 = arith.cmpf oeq, %32, %35 : vector<8x128xf32>
    %c128_i32 = arith.constant 128 : i32
    %37 = vector.broadcast %c128_i32 : i32 to vector<8x128xi32>
    %38 = arith.select %36, %5, %37 : vector<8x128xi1>, vector<8x128xi32>
    %cst_13 = arith.constant dense<2147483647> : vector<8xi32>
    %39 = vector.multi_reduction <minsi>, %38, %cst_13 [1] : vector<8x128xi32> to vector<8xi32>
    %40 = vector.shape_cast %39 : vector<8xi32> to vector<8x1xi32>
    %41 = vector.broadcast %40 : vector<8x1xi32> to vector<8x128xi32>
    %42 = arith.cmpi eq, %5, %41 : vector<8x128xi32>
    %cst_14 = arith.constant 0.000000e+00 : f32
    %43 = vector.broadcast %cst_14 : f32 to vector<8x128xf32>
    %44 = arith.select %42, %24, %43 : vector<8x128xi1>, vector<8x128xf32>
    %cst_15 = arith.constant dense<0.000000e+00> : vector<8xf32>
    %45 = vector.multi_reduction <add>, %44, %cst_15 [1] : vector<8x128xf32> to vector<8xf32>
    %46 = vector.shape_cast %45 : vector<8xf32> to vector<8x1xf32>
    %47 = arith.sitofp %40 : vector<8x1xi32> to vector<8x1xf32>
    %48 = math.absf %3 : vector<8x128xf32>
    %cst_16 = arith.constant 1.000000e+00 : f32
    %49 = vector.broadcast %cst_16 : f32 to vector<8x128xf32>
    %50 = arith.addf %49, %48 : vector<8x128xf32>
    %51 = arith.divf %3, %50 : vector<8x128xf32>
    %cst_17 = arith.constant -1.000000e+00 : f32
    %cst_18 = arith.constant 1.000000e+00 : f32
    %52 = vector.broadcast %cst_17 : f32 to vector<8x128xf32>
    %53 = arith.maximumf %52, %51 : vector<8x128xf32>
    %54 = vector.broadcast %cst_18 : f32 to vector<8x128xf32>
    %55 = arith.minimumf %54, %53 : vector<8x128xf32>
    %cst_19 = arith.constant 2.000000e+01 : f32
    %56 = vector.broadcast %cst_19 : f32 to vector<8x128xf32>
    %57 = arith.cmpf ogt, %3, %56 : vector<8x128xf32>
    %cst_20 = arith.constant 2.000000e+01 : f32
    %58 = vector.broadcast %cst_20 : f32 to vector<8x128xf32>
    %59 = arith.minimumf %3, %58 : vector<8x128xf32>
    %60 = math.exp %59 : vector<8x128xf32>
    %61 = math.log1p %60 : vector<8x128xf32>
    %62 = arith.select %57, %3, %61 : vector<8x128xi1>, vector<8x128xf32>
    %cst_21 = arith.constant 9.99999974E-6 : f32
    %63 = vector.broadcast %cst_21 : f32 to vector<8x128xf32>
    %64 = arith.addf %62, %63 : vector<8x128xf32>
    %cst_22 = arith.constant 6.28318548 : f32
    %65 = vector.broadcast %cst_22 : f32 to vector<8x128xf32>
    %66 = arith.mulf %65, %64 : vector<8x128xf32>
    %67 = math.sqrt %64 : vector<8x128xf32>
    %68 = arith.mulf %67, %4 : vector<8x128xf32>
    %69 = arith.mulf %4, %4 : vector<8x128xf32>
    %cst_23 = arith.constant -5.000000e-01 : f32
    %70 = vector.broadcast %cst_23 : f32 to vector<8x128xf32>
    %71 = arith.mulf %70, %69 : vector<8x128xf32>
    %72 = math.exp %71 : vector<8x128xf32>
    %73 = math.rsqrt %66 : vector<8x128xf32>
    %74 = arith.mulf %72, %73 : vector<8x128xf32>
    %cst_24 = arith.constant 9.99999997E-7 : f32
    %75 = vector.broadcast %cst_24 : f32 to vector<8x128xf32>
    %76 = arith.addf %74, %75 : vector<8x128xf32>
    %77 = math.log %76 : vector<8x128xf32>
    %78 = math.log %66 : vector<8x128xf32>
    %cst_25 = arith.constant 1.000000e+00 : f32
    %79 = vector.broadcast %cst_25 : f32 to vector<8x128xf32>
    %80 = arith.addf %78, %79 : vector<8x128xf32>
    %cst_26 = arith.constant 5.000000e-01 : f32
    %81 = vector.broadcast %cst_26 : f32 to vector<8x128xf32>
    %82 = arith.mulf %81, %80 : vector<8x128xf32>
    %cst_27 = arith.constant 0.000000e+00 : f32
    %83 = vector.broadcast %cst_27 : f32 to vector<8x128xf32>
    %c9_i32 = arith.constant 9 : i32
    %84 = vector.broadcast %c9_i32 : i32 to vector<8x128xi32>
    %85 = arith.cmpi eq, %5, %84 : vector<8x128xi32>
    %cst_28 = arith.constant 0.000000e+00 : f32
    %86 = vector.broadcast %cst_28 : f32 to vector<8x128xf32>
    %87 = arith.select %85, %68, %86 : vector<8x128xi1>, vector<8x128xf32>
    %cst_29 = arith.constant dense<0.000000e+00> : vector<8xf32>
    %88 = vector.multi_reduction <add>, %87, %cst_29 [1] : vector<8x128xf32> to vector<8xf32>
    %89 = vector.shape_cast %88 : vector<8xf32> to vector<8x1xf32>
    %c6_i32_30 = arith.constant 6 : i32
    %90 = vector.broadcast %c6_i32_30 : i32 to vector<8x128xi32>
    %91 = arith.cmpi eq, %5, %90 : vector<8x128xi32>
    %92 = vector.shape_cast %89 : vector<8x1xf32> to vector<8x1xf32>
    %93 = vector.broadcast %92 : vector<8x1xf32> to vector<8x128xf32>
    %94 = arith.select %91, %93, %83 : vector<8x128xi1>, vector<8x128xf32>
    %c10_i32 = arith.constant 10 : i32
    %95 = vector.broadcast %c10_i32 : i32 to vector<8x128xi32>
    %96 = arith.cmpi eq, %5, %95 : vector<8x128xi32>
    %cst_31 = arith.constant 0.000000e+00 : f32
    %97 = vector.broadcast %cst_31 : f32 to vector<8x128xf32>
    %98 = arith.select %96, %68, %97 : vector<8x128xi1>, vector<8x128xf32>
    %cst_32 = arith.constant dense<0.000000e+00> : vector<8xf32>
    %99 = vector.multi_reduction <add>, %98, %cst_32 [1] : vector<8x128xf32> to vector<8xf32>
    %100 = vector.shape_cast %99 : vector<8xf32> to vector<8x1xf32>
    %c7_i32 = arith.constant 7 : i32
    %101 = vector.broadcast %c7_i32 : i32 to vector<8x128xi32>
    %102 = arith.cmpi eq, %5, %101 : vector<8x128xi32>
    %103 = vector.shape_cast %100 : vector<8x1xf32> to vector<8x1xf32>
    %104 = vector.broadcast %103 : vector<8x1xf32> to vector<8x128xf32>
    %105 = arith.select %102, %104, %94 : vector<8x128xi1>, vector<8x128xf32>
    %c11_i32 = arith.constant 11 : i32
    %106 = vector.broadcast %c11_i32 : i32 to vector<8x128xi32>
    %107 = arith.cmpi eq, %5, %106 : vector<8x128xi32>
    %cst_33 = arith.constant 0.000000e+00 : f32
    %108 = vector.broadcast %cst_33 : f32 to vector<8x128xf32>
    %109 = arith.select %107, %68, %108 : vector<8x128xi1>, vector<8x128xf32>
    %cst_34 = arith.constant dense<0.000000e+00> : vector<8xf32>
    %110 = vector.multi_reduction <add>, %109, %cst_34 [1] : vector<8x128xf32> to vector<8xf32>
    %111 = vector.shape_cast %110 : vector<8xf32> to vector<8x1xf32>
    %c8_i32 = arith.constant 8 : i32
    %112 = vector.broadcast %c8_i32 : i32 to vector<8x128xi32>
    %113 = arith.cmpi eq, %5, %112 : vector<8x128xi32>
    %114 = vector.shape_cast %111 : vector<8x1xf32> to vector<8x1xf32>
    %115 = vector.broadcast %114 : vector<8x1xf32> to vector<8x128xf32>
    %116 = arith.select %113, %115, %105 : vector<8x128xi1>, vector<8x128xf32>
    %117 = arith.addf %55, %116 : vector<8x128xf32>
    %cst_35 = arith.constant -1.000000e+00 : f32
    %cst_36 = arith.constant 1.000000e+00 : f32
    %118 = vector.broadcast %cst_35 : f32 to vector<8x128xf32>
    %119 = arith.maximumf %118, %117 : vector<8x128xf32>
    %120 = vector.broadcast %cst_36 : f32 to vector<8x128xf32>
    %121 = arith.minimumf %120, %119 : vector<8x128xf32>
    %c6_i32_37 = arith.constant 6 : i32
    %122 = vector.broadcast %c6_i32_37 : i32 to vector<8x128xi32>
    %123 = arith.cmpi sge, %5, %122 : vector<8x128xi32>
    %c9_i32_38 = arith.constant 9 : i32
    %124 = vector.broadcast %c9_i32_38 : i32 to vector<8x128xi32>
    %125 = arith.cmpi slt, %5, %124 : vector<8x128xi32>
    %126 = arith.andi %123, %125 : vector<8x128xi1>
    %c9_i32_39 = arith.constant 9 : i32
    %127 = vector.broadcast %c9_i32_39 : i32 to vector<8x128xi32>
    %128 = arith.cmpi sge, %5, %127 : vector<8x128xi32>
    %c12_i32 = arith.constant 12 : i32
    %129 = vector.broadcast %c12_i32 : i32 to vector<8x128xi32>
    %130 = arith.cmpi slt, %5, %129 : vector<8x128xi32>
    %131 = arith.andi %128, %130 : vector<8x128xi1>
    %c12_i32_40 = arith.constant 12 : i32
    %132 = vector.broadcast %c12_i32_40 : i32 to vector<8x128xi32>
    %133 = arith.cmpi sge, %5, %132 : vector<8x128xi32>
    %c15_i32 = arith.constant 15 : i32
    %134 = vector.broadcast %c15_i32 : i32 to vector<8x128xi32>
    %135 = arith.cmpi slt, %5, %134 : vector<8x128xi32>
    %136 = arith.andi %133, %135 : vector<8x128xi1>
    %137 = arith.select %7, %24, %83 : vector<8x128xi1>, vector<8x128xf32>
    %138 = arith.select %126, %121, %137 : vector<8x128xi1>, vector<8x128xf32>
    %139 = arith.select %131, %77, %138 : vector<8x128xi1>, vector<8x128xf32>
    %140 = arith.select %136, %82, %139 : vector<8x128xi1>, vector<8x128xf32>
    %c15_i32_41 = arith.constant 15 : i32
    %141 = vector.broadcast %c15_i32_41 : i32 to vector<8x128xi32>
    %142 = arith.cmpi eq, %5, %141 : vector<8x128xi32>
    %143 = arith.select %142, %3, %140 : vector<8x128xi1>, vector<8x128xf32>
    %c16_i32 = arith.constant 16 : i32
    %144 = vector.broadcast %c16_i32 : i32 to vector<8x128xi32>
    %145 = arith.cmpi eq, %5, %144 : vector<8x128xi32>
    %146 = vector.shape_cast %47 : vector<8x1xf32> to vector<8x1xf32>
    %147 = vector.broadcast %146 : vector<8x1xf32> to vector<8x128xf32>
    %148 = arith.select %145, %147, %143 : vector<8x128xi1>, vector<8x128xf32>
    %c17_i32 = arith.constant 17 : i32
    %149 = vector.broadcast %c17_i32 : i32 to vector<8x128xi32>
    %150 = arith.cmpi eq, %5, %149 : vector<8x128xi32>
    %151 = vector.shape_cast %29 : vector<8x1xf32> to vector<8x1xf32>
    %152 = vector.broadcast %151 : vector<8x1xf32> to vector<8x128xf32>
    %153 = arith.select %150, %152, %148 : vector<8x128xi1>, vector<8x128xf32>
    %c18_i32 = arith.constant 18 : i32
    %154 = vector.broadcast %c18_i32 : i32 to vector<8x128xi32>
    %155 = arith.cmpi eq, %5, %154 : vector<8x128xi32>
    %156 = vector.shape_cast %46 : vector<8x1xf32> to vector<8x1xf32>
    %157 = vector.broadcast %156 : vector<8x1xf32> to vector<8x128xf32>
    %158 = arith.select %155, %157, %153 : vector<8x128xi1>, vector<8x128xf32>
    %c0_42 = arith.constant 0 : index
    %c0_43 = arith.constant 0 : index
    %159 = vector.load %arg3[%c0_42, %c0_43] : memref<8x128xf32, #tpu.memory_space<vmem>>, vector<8x128xf32>
    tpu.vector_store %arg3[%c0_42, %c0_43], %158 {strides = array<i32>} : memref<8x128xf32, #tpu.memory_space<vmem>>, vector<8x128xf32>,
    return
  }
}

</mosaic_0001>

<bundles_post_ra>
// kernel: tat_heads_forward.1
= control target key start
LH: loop header
LB: loop body
LE: loop exit
PB: predicated region body
PF: predicated region fallthrough
CT: control target
= control target key end

     0   :  { %8 = vsyncpa [#allocation3], 0  ;;  %s481_s0 = inlined_call_operand.hbm [shape: f32[8,32], index: 0, kind: input, shape index: {}]   ;;  %s482_s1 = inlined_call_operand.hbm [shape: bf16[32,128], index: 1, kind: input, shape index: {}]   ;;  %s483_s2 = inlined_call_operand.hbm [shape: f32[8,128], index: 2, kind: input, shape index: {}]   ;;  %s484_s3 = inlined_call_operand.vmem [shape: f32[8,128], index: 3, kind: output, shape index: {}]  }
   0x1   :  { %9 = vsyncpa [#allocation5], 0  ;;  %s370_s12 = smov [#allocation4]   ;;  %s300_s16 = scalar_lea.hbm %s482_s1, 256 }
   0x2   :  { %s25_s13 = sshll.u32 %s370_s12, 4  ;;  %p301_p0 = scmp.ne.s32.totalorder %s482_s1, %s300_s16  ;;  %s26_s13 = int_to_ptr.vmem [resolvable:$true] %s25_s13 }
   0x3   :  { %p304_p1 = scmp.lt.u32.totalorder %s300_s16, %s482_s1 }
   0x5   :  { %p306_p2 = pnand %p304_p1, %p301_p0 }
   0x7   :  { %309 = shalt.err (!%p306_p2)
}
   0x8   :  { %s310_s21 = scalar_lea.vmem %s26_s13, 256  ;;  %p315_p4 = scmp.lt.s32.totalorder %s26_s13, %s26_s13 }
   0x9   :  { %p311_p3 = scmp.ne.s32.totalorder %s26_s13, %s310_s21  ;;  %p316_p5 = scmp.lt.s32.totalorder %s310_s21, %s310_s21 }
   0xb   :  { %p317_p6 = por %p316_p5, %p315_p4 }
   0xd   :  { %p318_p7 = pnand %p317_p6, %p311_p3 }
   0xf   :  { %321 = shalt.err (!%p318_p7)
}
  0x10   :  { %s371_s22 = smov 64   ;;  %s372_s23 = smov 4  }
  0x11   :  { %31 = dma.hbm_to_vmem [thread:$0]  %s482_s1, 256, %s26_s13, [#allocation5], %s371_s22, %s371_s22, %s372_s23  }
  0x12   :  { %s373_s26 = smov [#allocation2]   ;;  %s374_s28 = smov [#allocation6]  }
  0x13   :  { %s16_s27 = sshll.u32 %s373_s26, 4  ;;  %s38_s29 = sshll.u32 %s374_s28, 4  ;;  %s17_s27 = int_to_ptr.vmem [resolvable:$true] %s16_s27  ;;  %s39_s29 = int_to_ptr.vmem [resolvable:$true] %s38_s29 }
  0x14   :  { %s322_s5 = scalar_lea.hbm %s481_s0, 128 }
  0x15   :  { %p323_p8 = scmp.ne.s32.totalorder %s481_s0, %s322_s5  ;;  %p326_p9 = scmp.lt.u32.totalorder %s322_s5, %s481_s0 }
  0x17   :  { %p328_p10 = pnand %p326_p9, %p323_p8 }
  0x19   :  { %331 = shalt.err (!%p328_p10)
}
  0x1a   :  { %s332_s1 = scalar_lea.vmem %s17_s27, 128  ;;  %p337_p12 = scmp.lt.s32.totalorder %s17_s27, %s17_s27 }
  0x1b   :  { %p333_p11 = scmp.ne.s32.totalorder %s17_s27, %s332_s1  ;;  %p338_p13 = scmp.lt.s32.totalorder %s332_s1, %s332_s1 }
  0x1d   :  { %p339_p0 = por %p338_p13, %p337_p12 }
  0x1f   :  { %p340_p1 = pnand %p339_p0, %p333_p11 }
  0x21   :  { %343 = shalt.err (!%p340_p1)
}
  0x22   :  { %19 = dma.hbm_to_vmem [thread:$0]  %s481_s0, 128, %s17_s27, [#allocation3]  }
  0x23   :  { %s344_s14 = scalar_lea.hbm %s483_s2, 128 }
  0x24   :  { %p345_p2 = scmp.ne.s32.totalorder %s483_s2, %s344_s14  ;;  %p348_p3 = scmp.lt.u32.totalorder %s344_s14, %s483_s2 }
  0x26   :  { %p350_p4 = pnand %p348_p3, %p345_p2 }
  0x28   :  { %353 = shalt.err (!%p350_p4)
}
  0x29   :  { %s354_s19 = scalar_lea.vmem %s39_s29, 128  ;;  %p359_p6 = scmp.lt.s32.totalorder %s39_s29, %s39_s29 }
  0x2a   :  { %p355_p5 = scmp.ne.s32.totalorder %s39_s29, %s354_s19  ;;  %p360_p7 = scmp.lt.s32.totalorder %s354_s19, %s354_s19 }
  0x2c   :  { %p361_p8 = por %p360_p7, %p359_p6 }
  0x2e   :  { %p362_p9 = pnand %p361_p8, %p355_p5 }
  0x30   :  { %365 = shalt.err (!%p362_p9)
}
  0x31   :  { %41 = dma.hbm_to_vmem [thread:$0]  %s483_s2, 128, %s39_s29, [#allocation5]  }
  0x32   :  { %366 = dma.done.wait [#allocation3], 128  }
  0x33   :  { %367 = vsyncadd [#allocation3], 4294967168 }
  0x34   :  { %368 = dma.done.wait [#allocation5], 384  }
  0x35   :  { %369 = vsyncadd [#allocation5], 4294966912  ;;  %v375_v0 = vmov 0.0   ;;  %vm376_vm0 = vmmov 0   ;;  %v276_v1 = vld [vmem:[#allocation4] sm:$0xff]   ;;  %v277_v2 = vld [vmem:[#allocation4 + $0x8] sm:$0xff]   ;;  %v115_v5 = vlaneseq }
  0x36   :  { %261 = vmatprep.subr.bf16.mxu0 %v375_v0  ;;  %265 = vmatprep.mubr.msk.bf16.mxu0 %vm376_vm0, %v375_v0  ;;  %v52_v3 = vld [vmem:[#allocation2] sm:$0xff]  ;;  %vm70_vm1 = vcmask 261120   ;;  %v114_v21 = vld [vmem:[#allocation6] sm:$0xff] }
  0x37   :  { %262 = vmatpush3.bf16.msra.mxu0 %v276_v1  ;;  %v53_v4 = vpack.c.bf16 %v52_v3, %v52_v3  ;;  %v433_v6 = vand.u32 127, %v115_v5  ;;  %v191_v57 = vmul.f32 %v114_v21, %v114_v21 }
  0x38   :  { %263 = vmatprep.subr.bf16.mxu0 %v375_v0 }
  0x39   :  { %vm117_vm2 = vcmp.lt.s32.totalorder %v433_v6, 6  ;;  %vm204_vm8 = vcmp.eq.s32.totalorder %v433_v6, 9  ;;  %vm216_vm9 = vcmp.eq.s32.totalorder %v433_v6, 11  ;;  %vm210_vm11 = vcmp.eq.s32.totalorder %v433_v6, 10 }
  0x3a   :  { %v192_v58 = vmul.f32 -0.5, %v191_v57  ;;  %vm208_vm12 = vcmp.eq.s32.totalorder %v433_v6, 6  ;;  %vm214_vm13 = vcmp.eq.s32.totalorder %v433_v6, 7  ;;  %vm220_vm14 = vcmp.eq.s32.totalorder %v433_v6, 8 }
  0x3b   :  { %264 = vmatpush3.bf16.msra.mxu0 %v277_v2  ;;  %vm225_vm15 = vcmp.ge.s32.totalorder %v433_v6, 6  ;;  %vm226_vm0 = vcmp.lt.s32.totalorder %v433_v6, 9 }
  0x3c   :  { %v193_v59 = vmul.f32 1.442695, %v192_v58 }
  0x3e   :  { %266 = vmatmul.mubr.msk.bf16.vlgmr.msra.gmra.mrb[0].mxu0 %vm70_vm1, %v53_v4 }
 0x111   :  { %v436_v7 = vpop.f32.mrb[0].mxu0 }
 0x112   :  { %v267_v8 = vpop.f32.mrb[1].mxu0  ;;  %v118_v9 = vsel %vm117_vm2, %v436_v7, -1e+30  ;;  %v168_v24 = vmin.f32 %v436_v7, 20.0  ;;  %vm167_vm4 = vcmp.gt.f32.partialorder %v436_v7, 20.0 }
 0x113   :  { %119 = vmax.xlane.f32.xlu0 %v118_v9  ;;  %v111_v10 = vpop.f32.mrb[2].mxu0  ;;  %v161_v61 = vand.u32 2147483647, %v436_v7 }
 0x114   :  { %v268_v11 = vpop.f32.mrb[3].mxu0  ;;  %v169_v25 = vmul.f32 1.442695, %v168_v24 }
 0x115   :  { %v162_v62 = vadd.f32 1.0, %v161_v61 }
 0x1a0   :  { %v120_v12 = vpop.xlane.xlu0 %119 }
 0x1a1   :  { %v121_v13 = vsub.f32 %v436_v7, %v120_v12 }
 0x1a3   :  { %v122_v14 = vsel %vm117_vm2, %v121_v13, -1e+30 }
 0x1a4   :  { %v123_v15 = vmul.f32 1.442695, %v122_v14 }
 0x1a6   :  { %278 = vpow2.f32 %v123_v15 }
 0x1b0   :  { %v279_v16 = vpop.eup %278 }
 0x1b1   :  { %125 = vadd.xlane.f32.xlu0 %v279_v16 }
 0x23e   :  { %v126_v17 = vpop.xlane.xlu0 %125 }
 0x23f   :  { %280 = vlog2.f32 %v126_v17 }
 0x240   :  { %282 = vpow2.f32 %v169_v25 }
 0x249   :  { %v281_v18 = vpop.eup %280 }
 0x24a   :  { %v130_v19 = vmul.f32 0.6931472, %v281_v18  ;;  %v283_v26 = vpop.eup %282 }
 0x24b   :  { %v171_v27 = vadd.f32 1.0, %v283_v26  ;;  %v174_v28 = vmul.f32 -0.5, %v283_v26  ;;  %v177_v31 = vand.u32 2147483647, %v283_v26 }
 0x24c   :  { %v444_v20 = vsub.f32 %v121_v13, %v130_v19 }
 0x24d   :  { %284 = vlog2.f32 %v171_v27  ;;  %v175_v30 = vadd.f32 1.0, %v174_v28  ;;  %vm178_vm3 = vcmp.lt.f32.partialorder %v177_v31, 0.0004427343 }
 0x24e   :  { %v136_v22 = vadd.f32 %v444_v20, %v114_v21  ;;  %v234_v28 = vsel %vm117_vm2, %v444_v20, 0.0 }
 0x24f   :  { %v176_v33 = vmul.f32 %v283_v26, %v175_v30 }
 0x250   :  { %v137_v23 = vsel %vm117_vm2, %v136_v22, -1e+30 }
 0x251   :  { %138 = vmax.xlane.f32.xlu1 %v137_v23 }
 0x257   :  { %v285_v29 = vpop.eup %284 }
 0x258   :  { %v173_v32 = vmul.f32 0.6931472, %v285_v29 }
 0x25a   :  { %v179_v34 = vsel %vm178_vm3, %v176_v33, %v173_v32  ;;  %vm228_vm3 = vcmp.ge.s32.totalorder %v433_v6, 9 }
 0x25b   :  { %v180_v35 = vsel %vm167_vm4, %v436_v7, %v179_v34  ;;  %vm229_vm4 = vcmp.lt.s32.totalorder %v433_v6, 12 }
 0x25c   :  { %v181_v36 = vadd.f32 1e-05, %v180_v35 }
 0x25e   :  { %286 = vrsqrt.f32 %v181_v36  ;;  %vm185_vm5 = vcmp.eq.f32.partialorder %v181_v36, inf  ;;  %v188_v41 = vand.u32 2147483648, %v181_v36  ;;  %vm187_vm7 = vcmp.eq.f32.partialorder %v181_v36, 0.0 }
 0x25f   :  { %288 = vrcp.f32 %v126_v17  ;;  %v182_v60 = vmul.f32 6.2831855, %v181_v36 }
 0x260   :  { %290 = vpow2.f32 %v193_v59 }
 0x261   :  { %292 = vrsqrt.f32 %v182_v60 }
 0x262   :  { %294 = vrcp.f32 %v162_v62 }
 0x263   :  { %296 = vlog2.f32 %v182_v60 }
 0x268   :  { %v287_v37 = vpop.eup %286 }
 0x269   :  { %v184_v38 = vmul.f32 %v287_v37, %v181_v36  ;;  %v289_v53 = vpop.eup %288 }
 0x26a   :  { %v128_v55 = vmul.f32 %v289_v53, %v279_v16  ;;  %v291_v63 = vpop.eup %290 }
 0x26b   :  { %v186_v40 = vsel %vm185_vm5, %v181_v36, %v184_v38  ;;  %v293_v0 = vpop.eup %292  ;;  %vm231_vm5 = vcmp.ge.s32.totalorder %v433_v6, 12 }
 0x26c   :  { %v189_v44 = vsel %vm187_vm7, %v188_v41, %v186_v40  ;;  %v132_v56 = vmul.f32 %v444_v20, %v128_v55  ;;  %v196_v1 = vmul.f32 %v293_v0, %v291_v63  ;;  %v295_v3 = vpop.eup %294  ;;  %vm227_vm7 = vmand %vm225_vm15, %vm226_vm0 }
 0x26d   :  { %v190_v46 = vmul.f32 %v189_v44, %v114_v21  ;;  %v297_v8 = vpop.eup %296  ;;  %v164_v10 = vmul.f32 %v295_v3, %v436_v7 }
 0x26e   :  { %v197_v2 = vadd.f32 1e-06, %v196_v1  ;;  %v201_v14 = vmul.f32 0.6931472, %v297_v8 }
 0x26f   :  { %v205_v47 = vsel %vm204_vm8, %v190_v46, 0.0  ;;  %v217_v48 = vsel %vm216_vm9, %v190_v46, 0.0  ;;  %v211_v54 = vsel %vm210_vm11, %v190_v46, 0.0  ;;  %v256_v16 = vclamps-f32 %v164_v10, 1.0  ;;  %vm230_vm8 = vmand %vm228_vm3, %vm229_vm4 }
 0x270   :  { %298 = vlog2.f32 %v197_v2  ;;  %v202_v25 = vadd.f32 1.0, %v201_v14  ;;  %vm240_vm11 = vcmp.eq.s32.totalorder %v433_v6, 16 }
 0x272   :  { %v203_v30 = vmul.f32 0.5, %v202_v25 }
 0x2de   :  { %v139_v39 = vpop.xlane.xlu1 %138 }
 0x2df   :  { %vm140_vm6 = vcmp.eq.f32.partialorder %v137_v23, %v139_v39  ;;  %v299_v23 = vpop.eup %298 }
 0x2e0   :  { %v141_v42 = vsel %vm140_vm6, %v433_v6, 128  ;;  %vm232_vm6 = vcmp.lt.s32.totalorder %v433_v6, 15  ;;  %v199_v27 = vmul.f32 0.6931472, %v299_v23 }
 0x2e1   :  { %v143_v43 = vshra.s32 %v141_v42, 16  ;;  %v142_v49 = vand.u32 65535, %v141_v42  ;;  %vm233_vm9 = vmand %vm231_vm5, %vm232_vm6 }
 0x2e3   :  { %v145_v45 = vcvt.s32.f32 %v143_v43  ;;  %v144_v51 = vcvt.s32.f32 %v142_v49 }
 0x2e5   :  { %146 = vmin.xlane.f32.xlu1 %v145_v45 }
 0x2e9   :  { %206 = vadd.xlane.f32.xlu1 %v205_v47 }
 0x2ed   :  { %218 = vadd.xlane.f32.xlu1 %v217_v48 }
 0x372   :  { %v147_v50 = vpop.xlane.xlu1 %146 }
 0x373   :  { %vm148_vm10 = vcmp.eq.f32.partialorder %v145_v45, %v147_v50  ;;  %v153_v4 = vcvt.f32.s32 %v147_v50 }
 0x374   :  { %v149_v52 = vsel %vm148_vm10, %v144_v51, inf  ;;  %vm238_vm10 = vcmp.eq.s32.totalorder %v433_v6, 15 }
 0x375   :  { %150 = vmin.xlane.f32.xlu0 %v149_v52  ;;  %v154_v11 = vshll.u32 %v153_v4, 16 }
 0x376   :  { %v207_v5 = vpop.xlane.xlu1 %206 }
 0x377   :  { %v209_v15 = vsel %vm208_vm12, %v207_v5, 0.0  ;;  %vm242_vm12 = vcmp.eq.s32.totalorder %v433_v6, 17 }
 0x379   :  { %212 = vadd.xlane.f32.xlu0 %v211_v54 }
 0x37a   :  { %v219_v18 = vpop.xlane.xlu1 %218 }
 0x37d   :  { %133 = vadd.xlane.f32.xlu0 %v132_v56 }
 0x402   :  { %v151_v9 = vpop.xlane.xlu0 %150 }
 0x403   :  { %v152_v12 = vcvt.f32.s32 %v151_v9 }
 0x405   :  { %v155_v13 = vadd.s32 %v154_v11, %v152_v12 }
 0x406   :  { %v213_v17 = vpop.xlane.xlu0 %212 }
 0x407   :  { %v215_v19 = vsel %vm214_vm13, %v213_v17, %v209_v15  ;;  %vm156_vm1 = vcmp.eq.s32.totalorder %v433_v6, %v155_v13  ;;  %v160_v32 = vcvt.s32.f32 %v155_v13  ;;  %vm244_vm13 = vcmp.eq.s32.totalorder %v433_v6, 18 }
 0x408   :  { %v221_v21 = vsel %vm220_vm14, %v219_v18, %v215_v19  ;;  %v157_v22 = vsel %vm156_vm1, %v444_v20, 0.0 }
 0x409   :  { %v222_v24 = vadd.f32 %v256_v16, %v221_v21  ;;  %158 = vadd.xlane.f32.xlu1 %v157_v22 }
 0x40a   :  { %v134_v36 = vpop.xlane.xlu0 %133 }
 0x40b   :  { %v257_v26 = vclamps-f32 %v222_v24, 1.0  ;;  %v135_v37 = vsub.f32 0.0, %v134_v36 }
 0x40d   :  { %v235_v29 = vsel %vm227_vm7, %v257_v26, %v234_v28 }
 0x40e   :  { %v236_v31 = vsel %vm230_vm8, %v199_v27, %v235_v29 }
 0x40f   :  { %v237_v33 = vsel %vm233_vm9, %v203_v30, %v236_v31 }
 0x410   :  { %v239_v34 = vsel %vm238_vm10, %v436_v7, %v237_v33 }
 0x411   :  { %v241_v35 = vsel %vm240_vm11, %v160_v32, %v239_v34 }
 0x412   :  { %v243_v38 = vsel %vm242_vm12, %v135_v37, %v241_v35 }
 0x496   :  { %v159_v20 = vpop.xlane.xlu1 %158 }
 0x497   :  { %v245_v39 = vsel %vm244_vm13, %v159_v20, %v243_v38 }
 0x498   :  { %246 = vst [vmem:[%s484_s3] sm:$0xff] %v245_v39 }
 0x499   :  { %251 = vsyncpa [#allocation3], 1 }
 0x49a   :  { %252 = vsyncpa [#allocation5], 1 }

</bundles_post_ra>
